<compile_context>
chip_gen: v7x
topology: tpu7x:2x2x1
jax: 0.10.0
libtpu: 0.0.40
codegen_flags: <defaults>
</compile_context>

<pallas_src>
import functools

import jax
import jax.numpy as jnp
from jax.experimental import pallas as pl
from jax.experimental.pallas import tpu as pltpu

BN_EPS = 1e-5


def _round_up(n, m):
    return (n + m - 1) // m * m


def _pad2(a, rows, cols, dtype=None):
    if dtype is not None:
        a = a.astype(dtype)
    return jnp.pad(a, ((0, rows - a.shape[0]), (0, cols - a.shape[1])))


def _vmem_budget_bytes():
    """Generation-aware VMEM budget with headroom for compiler scratch."""
    cap = 64 << 20  # conservative default (v7x physical VMEM per TC)
    try:
        info = pltpu.get_tpu_info()
        cap = int(getattr(info, "vmem_capacity_bytes", cap))
    except Exception:
        pass
    # ~80% of physical and at least 12 MiB of headroom; never below 16 MiB.
    return max(16 << 20, min(int(cap * 0.8), cap - (12 << 20)))


def _pick_tm(B, Dp, Hp, Op, budget):
    """Tile size for the batch-tiled fallback, derived from the VMEM budget."""
    fixed = 2 * (Dp * Hp + Hp * Op) * 2 + (8 << 20)      # bf16 weights (x2) + slack
    per_row = 2 * max(Dp * 2 + Hp * 2,                    # pass 1: x bf16 + h bf16
                      Hp * 2 + Op * 4)                    # pass 2: h bf16 + y f32
    tm = (budget - fixed) // per_row
    tm = int(max(8, min((tm // 8) * 8, 2048)))
    return min(tm, _round_up(B, 8))


# --------------------------- kernels -----------------------------------------


def _fused_mlp_kernel(x_ref, w1_ref, g1_ref, bt1_ref, w2_ref, g2_ref, bt2_ref,
                      o_ref, *, b_real):
    """Whole MLP in VMEM: Linear1 -> exact two-pass BN1 stats -> BN1+ReLU ->
    Linear2 -> exact two-pass BN2 stats -> BN2+ReLU.  Padded batch rows are
    masked out of all statistics; linear biases are dropped (BN cancels them).
    """
    inv_b = jnp.float32(1.0 / b_real)

    h = jnp.dot(x_ref[...], w1_ref[...], preferred_element_type=jnp.float32)
    rows_h = jax.lax.broadcasted_iota(jnp.int32, h.shape, 0)
    valid_h = rows_h < b_real
    mu1 = jnp.sum(jnp.where(valid_h, h, 0.0), axis=0, keepdims=True) * inv_b
    d1 = h - mu1
    var1 = jnp.sum(jnp.where(valid_h, d1 * d1, 0.0), axis=0, keepdims=True) * inv_b
    a = jnp.maximum(
        d1 * (g1_ref[...] * jax.lax.rsqrt(var1 + BN_EPS)) + bt1_ref[...], 0.0)

    y = jnp.dot(a.astype(jnp.bfloat16), w2_ref[...],
                preferred_element_type=jnp.float32)
    rows_y = jax.lax.broadcasted_iota(jnp.int32, y.shape, 0)
    valid_y = rows_y < b_real
    mu2 = jnp.sum(jnp.where(valid_y, y, 0.0), axis=0, keepdims=True) * inv_b
    d2 = y - mu2
    var2 = jnp.sum(jnp.where(valid_y, d2 * d2, 0.0), axis=0, keepdims=True) * inv_b
    o_ref[...] = jnp.maximum(
        d2 * (g2_ref[...] * jax.lax.rsqrt(var2 + BN_EPS)) + bt2_ref[...], 0.0)


def _linear1_stats_kernel(x_ref, w1_ref, h_ref, st_ref, *, tm, b_real):
    """h = x @ W1 (bf16 MXU, f32 acc), h stored bf16, per-tile masked partial
    sum / sum-of-squares written to this tile's own stats slot."""
    i = pl.program_id(0)
    h = jnp.dot(x_ref[...], w1_ref[...], preferred_element_type=jnp.float32)
    h_ref[...] = h.astype(h_ref.dtype)

    row = jax.lax.broadcasted_iota(jnp.int32, h.shape, 0) + i * tm
    hm = jnp.where(row < b_real, h, 0.0)
    st_ref[0:1, :] = jnp.sum(hm, axis=0, keepdims=True)
    st_ref[1:2, :] = jnp.sum(hm * hm, axis=0, keepdims=True)


def _bn_relu_linear2_stats_kernel(h_ref, s1_ref, t1_ref, w2_ref,
                                  y_ref, st_ref, *, tm, b_real):
    """BN1 (folded scale/shift FMA) + ReLU + second matmul + per-tile partial
    stats of y."""
    i = pl.program_id(0)
    a = jnp.maximum(h_ref[...].astype(jnp.float32) * s1_ref[...] + t1_ref[...],
                    0.0)
    y = jnp.dot(a.astype(jnp.bfloat16), w2_ref[...],
                preferred_element_type=jnp.float32)
    y_ref[...] = y

    row = jax.lax.broadcasted_iota(jnp.int32, y.shape, 0) + i * tm
    ym = jnp.where(row < b_real, y, 0.0)
    st_ref[0:1, :] = jnp.sum(ym, axis=0, keepdims=True)
    st_ref[1:2, :] = jnp.sum(ym * ym, axis=0, keepdims=True)


# --------------------------- wrapper ------------------------------------------


def mlp_forward(x_nchw, params, *, force_tiled=False, tm_override=None):
    """x_nchw: (B, C, H, W) float32. Returns (B, output_size) float32."""
    w1, b1, g1, bt1, w2, b2, g2, bt2 = params
    # b1/b2 cancel exactly under the following BatchNorm (it subtracts the
    # batch mean), so the kernels never add them.
    del b1, b2

    B = x_nchw.shape[0]
    x2d = x_nchw.reshape(B, -1).astype(jnp.float32)   # x.view(B, -1)
    D, H = w1.shape
    O = w2.shape[1]
    assert x2d.shape[1] == D

    Dp, Hp, Op = _round_up(D, 128), _round_up(H, 128), _round_up(O, 128)
    budget = _vmem_budget_bytes()

    w1p = _pad2(w1, Dp, Hp, jnp.bfloat16)     # bf16 weights: half DMA / VMEM
    w2p = _pad2(w2, Hp, Op, jnp.bfloat16)
    g1p, bt1p = _pad2(g1, 1, Hp), _pad2(bt1, 1, Hp)
    g2p, bt2p = _pad2(g2, 1, Op), _pad2(bt2, 1, Op)

    # ---- fused single-kernel path (everything VMEM-resident) ----------------
    Bp1 = _round_up(B, 8)
    fused_bytes = (Bp1 * Dp * 2 + Dp * Hp * 2 + Hp * Op * 2        # x, W1, W2
                   + Bp1 * (Hp + Op) * 4 * 3                       # f32 working set
                   + Bp1 * Op * 4 + 4 * (Hp + Op) * 4              # out + BN params
                   + (8 << 20))                                    # slack
    if not force_tiled and fused_bytes <= budget:
        xp = _pad2(x2d, Bp1, Dp, jnp.bfloat16)
        out_p = pl.pallas_call(
            functools.partial(_fused_mlp_kernel, b_real=B),
            out_shape=jax.ShapeDtypeStruct((Bp1, Op), jnp.float32),
            compiler_params=pltpu.CompilerParams(vmem_limit_bytes=budget),
        )(xp, w1p, g1p, bt1p, w2p, g2p, bt2p)
        return out_p[:B, :O]

    # ---- batch-tiled two-pass fallback (large B) -----------------------------
    tm = tm_override if tm_override is not None else _pick_tm(B, Dp, Hp, Op, budget)
    tm = max(8, _round_up(min(tm, _round_up(B, 8)), 8))
    Bp = _round_up(B, tm)
    nb = Bp // tm
    xp = _pad2(x2d, Bp, Dp, jnp.bfloat16)

    # pass 1: h = x @ W1 (bf16 out) + per-tile partial batch stats of h
    h1, st1 = pl.pallas_call(
        functools.partial(_linear1_stats_kernel, tm=tm, b_real=B),
        grid=(nb,),
        in_specs=[
            pl.BlockSpec((tm, Dp), lambda i: (i, 0)),   # x tiles stream in
            pl.BlockSpec((Dp, Hp), lambda i: (0, 0)),   # W1 resident
        ],
        out_specs=[
            pl.BlockSpec((tm, Hp), lambda i: (i, 0)),
            pl.BlockSpec((None, 2, Hp), lambda i: (i, 0, 0)),  # per-tile slot
        ],
        out_shape=[
            jax.ShapeDtypeStruct((Bp, Hp), jnp.bfloat16),
            jax.ShapeDtypeStruct((nb, 2, Hp), jnp.float32),
        ],
        compiler_params=pltpu.CompilerParams(
            dimension_semantics=("parallel",),   # no revisits -> megacore OK
            vmem_limit_bytes=budget),
    )(xp, w1p)

    ssum1 = jnp.sum(st1, axis=0)                          # (2, Hp)
    mu1 = ssum1[0:1] / B
    # One-pass E[h^2]-mu^2 (sums taken from f32 h); the small-B fused path
    # above uses exact two-pass statistics instead.
    var1 = jnp.maximum(ssum1[1:2] / B - mu1 * mu1, 0.0)
    s1 = g1p * jax.lax.rsqrt(var1 + BN_EPS)
    t1 = bt1p - mu1 * s1

    # pass 2: BN1 + ReLU + y = a @ W2, plus per-tile partial batch stats of y
    y, st2 = pl.pallas_call(
        functools.partial(_bn_relu_linear2_stats_kernel, tm=tm, b_real=B),
        grid=(nb,),
        in_specs=[
            pl.BlockSpec((tm, Hp), lambda i: (i, 0)),
            pl.BlockSpec((1, Hp), lambda i: (0, 0)),
            pl.BlockSpec((1, Hp), lambda i: (0, 0)),
            pl.BlockSpec((Hp, Op), lambda i: (0, 0)),   # W2 resident
        ],
        out_specs=[
            pl.BlockSpec((tm, Op), lambda i: (i, 0)),
            pl.BlockSpec((None, 2, Op), lambda i: (i, 0, 0)),
        ],
        out_shape=[
            jax.ShapeDtypeStruct((Bp, Op), jnp.float32),
            jax.ShapeDtypeStruct((nb, 2, Op), jnp.float32),
        ],
        compiler_params=pltpu.CompilerParams(
            dimension_semantics=("parallel",),
            vmem_limit_bytes=budget),
    )(h1, s1, t1, w2p)

    ssum2 = jnp.sum(st2, axis=0)
    mu2 = ssum2[0:1] / B
    var2 = jnp.maximum(ssum2[1:2] / B - mu2 * mu2, 0.0)
    s2 = g2p * jax.lax.rsqrt(var2 + BN_EPS)
    t2 = bt2p - mu2 * s2

    # BN2 + ReLU + slice: single cheap XLA elementwise op (old pass 3 removed)
    return jnp.maximum(y[:B, :O] * s2[:, :O] + t2[:, :O], 0.0)


# --------------------------- params / reference -------------------------------


def init_params(key, input_size, hidden_size, output_size):
    """Deterministic synthetic parameters (matches shapes of the torch module)."""
    k1, k2, k3, k4 = jax.random.split(key, 4)
    # Linear weights stored as (in, out) == torch weight.T ; biases as (1, out)
    w1 = jax.random.normal(k1, (input_size, hidden_size), jnp.float32) * 0.02
    b1 = jax.random.normal(k2, (1, hidden_size), jnp.float32) * 0.01
    w2 = jax.random.normal(k3, (hidden_size, output_size), jnp.float32) * 0.02
    b2 = jax.random.normal(k4, (1, output_size), jnp.float32) * 0.01
    # BatchNorm affine params (gamma=1, beta=0 is the torch default init)
    g1 = jnp.ones((1, hidden_size), jnp.float32)
    bt1 = jnp.zeros((1, hidden_size), jnp.float32)
    g2 = jnp.ones((1, output_size), jnp.float32)
    bt2 = jnp.zeros((1, output_size), jnp.float32)
    return (w1, b1, g1, bt1, w2, b2, g2, bt2)


def _reference(x_nchw, params):
    """Pure-JAX reference mirroring the torch module (training-mode BN, biases
    included) with the kernel's bf16-operand / f32-accumulate matmuls."""
    w1, b1, g1, bt1, w2, b2, g2, bt2 = params
    x = x_nchw.reshape(x_nchw.shape[0], -1).astype(jnp.float32)
    h = jnp.dot(x.astype(jnp.bfloat16), w1.astype(jnp.bfloat16),
                preferred_element_type=jnp.float32) + b1
    mu = h.mean(0, keepdims=True)
    var = ((h - mu) ** 2).mean(0, keepdims=True)
    a = jnp.maximum((h - mu) * jax.lax.rsqrt(var + BN_EPS) * g1 + bt1, 0.0)
    y = jnp.dot(a.astype(jnp.bfloat16), w2.astype(jnp.bfloat16),
                preferred_element_type=jnp.float32) + b2
    mu = y.mean(0, keepdims=True)
    var = ((y - mu) ** 2).mean(0, keepdims=True)
    return jnp.maximum((y - mu) * jax.lax.rsqrt(var + BN_EPS) * g2 + bt2, 0.0)


if __name__ == "__main__":
    key = jax.random.PRNGKey(0)
    kx, kp, kx2 = jax.random.split(key, 3)

    # Small shapes: batch=2, channels=4, spatial=16x16 -> input_size = 1024
    B, C, Hh, Ww = 2, 4, 16, 16
    input_size = C * Hh * Ww
    hidden_size = 32
    output_size = 8

    x = jax.random.normal(kx, (B, C, Hh, Ww), jnp.float32)
    params = init_params(kp, input_size, hidden_size, output_size)

    # --- fused single-kernel path (the one that fires for these shapes) ------
    fwd = jax.jit(mlp_forward)
    out = jax.block_until_ready(fwd(x, params))
    ref = _reference(x, params)
    assert out.shape == (B, output_size)
    assert jnp.allclose(out, ref, atol=2e-3, rtol=2e-3), (
        "fused path mismatch vs reference: max abs err "
        f"{float(jnp.max(jnp.abs(out - ref))):.3e}")

    # --- batch-tiled fallback path (forced, to validate the large-B route) ---
    B2 = 48
    x2 = jax.random.normal(kx2, (B2, C, Hh, Ww), jnp.float32)
    fwd_tiled = jax.jit(functools.partial(mlp_forward, force_tiled=True,
                                          tm_override=16))
    out2 = jax.block_until_ready(fwd_tiled(x2, params))
    ref2 = _reference(x2, params)
    assert out2.shape == (B2, output_size)
    assert jnp.allclose(out2, ref2, atol=3e-2, rtol=3e-2), (
        "tiled path mismatch vs reference: max abs err "
        f"{float(jnp.max(jnp.abs(out2 - ref2))):.3e}")

    print("KERNEL_OK")
</pallas_src>

<mosaic_0001>
module attributes {stable_mosaic.version = 11 : i64} {
  func.func @_fused_mlp_kernel(%arg0: memref<8x1024xbf16, #tpu.memory_space<vmem>>, %arg1: memref<1024x128xbf16, #tpu.memory_space<vmem>>, %arg2: memref<1x128xf32, #tpu.memory_space<vmem>>, %arg3: memref<1x128xf32, #tpu.memory_space<vmem>>, %arg4: memref<128x128xbf16, #tpu.memory_space<vmem>>, %arg5: memref<1x128xf32, #tpu.memory_space<vmem>>, %arg6: memref<1x128xf32, #tpu.memory_space<vmem>>, %arg7: memref<8x128xf32, #tpu.memory_space<vmem>>) attributes {dimension_semantics = [], scalar_prefetch = 0 : i64, scratch_operands = 0 : i64, tpu.core_type = #tpu.core_type<tc>} {
    %c0 = arith.constant 0 : index
    %c0_0 = arith.constant 0 : index
    %0 = vector.load %arg0[%c0, %c0_0] : memref<8x1024xbf16, #tpu.memory_space<vmem>>, vector<8x1024xbf16>
    %c0_1 = arith.constant 0 : index
    %c0_2 = arith.constant 0 : index
    %1 = vector.load %arg1[%c0_1, %c0_2] : memref<1024x128xbf16, #tpu.memory_space<vmem>>, vector<1024x128xbf16>
    %cst = arith.constant dense<0.000000e+00> : vector<8x128xf32>
    %2 = tpu.matmul %0, %1, %cst {dimension_numbers = #tpu.dot_dimension_numbers<[1], [0], [0], [1], [0, 0, 1, 1], [], []>} : vector<8x1024xbf16>, vector<1024x128xbf16>, vector<8x128xf32> -> vector<8x128xf32>
    %3 = tpu.iota {dimensions = array<i32: 0>} : vector<8x128xi32>
    %c2_i32 = arith.constant 2 : i32
    %4 = vector.broadcast %c2_i32 : i32 to vector<8x128xi32>
    %5 = arith.cmpi slt, %3, %4 : vector<8x128xi32>
    %cst_3 = arith.constant 0.000000e+00 : f32
    %6 = vector.broadcast %cst_3 : f32 to vector<8x128xf32>
    %7 = arith.select %5, %2, %6 : vector<8x128xi1>, vector<8x128xf32>
    %cst_4 = arith.constant dense<0.000000e+00> : vector<128xf32>
    %8 = vector.multi_reduction <add>, %7, %cst_4 [0] : vector<8x128xf32> to vector<128xf32>
    %9 = vector.shape_cast %8 : vector<128xf32> to vector<1x128xf32>
    %cst_5 = arith.constant 5.000000e-01 : f32
    %10 = vector.broadcast %cst_5 : f32 to vector<1x128xf32>
    %11 = arith.mulf %9, %10 : vector<1x128xf32>
    %12 = vector.broadcast %11 : vector<1x128xf32> to vector<8x128xf32>
    %13 = arith.subf %2, %12 : vector<8x128xf32>
    %14 = arith.mulf %13, %13 : vector<8x128xf32>
    %cst_6 = arith.constant 0.000000e+00 : f32
    %15 = vector.broadcast %cst_6 : f32 to vector<8x128xf32>
    %16 = arith.select %5, %14, %15 : vector<8x128xi1>, vector<8x128xf32>
    %cst_7 = arith.constant dense<0.000000e+00> : vector<128xf32>
    %17 = vector.multi_reduction <add>, %16, %cst_7 [0] : vector<8x128xf32> to vector<128xf32>
    %18 = vector.shape_cast %17 : vector<128xf32> to vector<1x128xf32>
    %cst_8 = arith.constant 5.000000e-01 : f32
    %19 = vector.broadcast %cst_8 : f32 to vector<1x128xf32>
    %20 = arith.mulf %18, %19 : vector<1x128xf32>
    %c0_9 = arith.constant 0 : index
    %c0_10 = arith.constant 0 : index
    %21 = vector.load %arg2[%c0_9, %c0_10] : memref<1x128xf32, #tpu.memory_space<vmem>>, vector<1x128xf32>
    %cst_11 = arith.constant 9.99999974E-6 : f32
    %22 = vector.broadcast %cst_11 : f32 to vector<1x128xf32>
    %23 = arith.addf %20, %22 : vector<1x128xf32>
    %24 = math.rsqrt %23 : vector<1x128xf32>
    %25 = arith.mulf %21, %24 : vector<1x128xf32>
    %26 = vector.broadcast %25 : vector<1x128xf32> to vector<8x128xf32>
    %27 = arith.mulf %13, %26 : vector<8x128xf32>
    %c0_12 = arith.constant 0 : index
    %c0_13 = arith.constant 0 : index
    %28 = vector.load %arg3[%c0_12, %c0_13] : memref<1x128xf32, #tpu.memory_space<vmem>>, vector<1x128xf32>
    %29 = vector.broadcast %28 : vector<1x128xf32> to vector<8x128xf32>
    %30 = arith.addf %27, %29 : vector<8x128xf32>
    %cst_14 = arith.constant 0.000000e+00 : f32
    %31 = vector.broadcast %cst_14 : f32 to vector<8x128xf32>
    %32 = arith.maximumf %30, %31 : vector<8x128xf32>
    %33 = arith.truncf %32 : vector<8x128xf32> to vector<8x128xbf16>
    %c0_15 = arith.constant 0 : index
    %c0_16 = arith.constant 0 : index
    %34 = vector.load %arg4[%c0_15, %c0_16] : memref<128x128xbf16, #tpu.memory_space<vmem>>, vector<128x128xbf16>
    %cst_17 = arith.constant dense<0.000000e+00> : vector<8x128xf32>
    %35 = tpu.matmul %33, %34, %cst_17 {dimension_numbers = #tpu.dot_dimension_numbers<[1], [0], [0], [1], [0, 0, 1, 1], [], []>} : vector<8x128xbf16>, vector<128x128xbf16>, vector<8x128xf32> -> vector<8x128xf32>
    %36 = tpu.iota {dimensions = array<i32: 0>} : vector<8x128xi32>
    %c2_i32_18 = arith.constant 2 : i32
    %37 = vector.broadcast %c2_i32_18 : i32 to vector<8x128xi32>
    %38 = arith.cmpi slt, %36, %37 : vector<8x128xi32>
    %cst_19 = arith.constant 0.000000e+00 : f32
    %39 = vector.broadcast %cst_19 : f32 to vector<8x128xf32>
    %40 = arith.select %38, %35, %39 : vector<8x128xi1>, vector<8x128xf32>
    %cst_20 = arith.constant dense<0.000000e+00> : vector<128xf32>
    %41 = vector.multi_reduction <add>, %40, %cst_20 [0] : vector<8x128xf32> to vector<128xf32>
    %42 = vector.shape_cast %41 : vector<128xf32> to vector<1x128xf32>
    %cst_21 = arith.constant 5.000000e-01 : f32
    %43 = vector.broadcast %cst_21 : f32 to vector<1x128xf32>
    %44 = arith.mulf %42, %43 : vector<1x128xf32>
    %45 = vector.broadcast %44 : vector<1x128xf32> to vector<8x128xf32>
    %46 = arith.subf %35, %45 : vector<8x128xf32>
    %47 = arith.mulf %46, %46 : vector<8x128xf32>
    %cst_22 = arith.constant 0.000000e+00 : f32
    %48 = vector.broadcast %cst_22 : f32 to vector<8x128xf32>
    %49 = arith.select %38, %47, %48 : vector<8x128xi1>, vector<8x128xf32>
    %cst_23 = arith.constant dense<0.000000e+00> : vector<128xf32>
    %50 = vector.multi_reduction <add>, %49, %cst_23 [0] : vector<8x128xf32> to vector<128xf32>
    %51 = vector.shape_cast %50 : vector<128xf32> to vector<1x128xf32>
    %cst_24 = arith.constant 5.000000e-01 : f32
    %52 = vector.broadcast %cst_24 : f32 to vector<1x128xf32>
    %53 = arith.mulf %51, %52 : vector<1x128xf32>
    %c0_25 = arith.constant 0 : index
    %c0_26 = arith.constant 0 : index
    %54 = vector.load %arg5[%c0_25, %c0_26] : memref<1x128xf32, #tpu.memory_space<vmem>>, vector<1x128xf32>
    %cst_27 = arith.constant 9.99999974E-6 : f32
    %55 = vector.broadcast %cst_27 : f32 to vector<1x128xf32>
    %56 = arith.addf %53, %55 : vector<1x128xf32>
    %57 = math.rsqrt %56 : vector<1x128xf32>
    %58 = arith.mulf %54, %57 : vector<1x128xf32>
    %59 = vector.broadcast %58 : vector<1x128xf32> to vector<8x128xf32>
    %60 = arith.mulf %46, %59 : vector<8x128xf32>
    %c0_28 = arith.constant 0 : index
    %c0_29 = arith.constant 0 : index
    %61 = vector.load %arg6[%c0_28, %c0_29] : memref<1x128xf32, #tpu.memory_space<vmem>>, vector<1x128xf32>
    %62 = vector.broadcast %61 : vector<1x128xf32> to vector<8x128xf32>
    %63 = arith.addf %60, %62 : vector<8x128xf32>
    %cst_30 = arith.constant 0.000000e+00 : f32
    %64 = vector.broadcast %cst_30 : f32 to vector<8x128xf32>
    %65 = arith.maximumf %63, %64 : vector<8x128xf32>
    %c0_31 = arith.constant 0 : index
    %c0_32 = arith.constant 0 : index
    %66 = vector.load %arg7[%c0_31, %c0_32] : memref<8x128xf32, #tpu.memory_space<vmem>>, vector<8x128xf32>
    tpu.vector_store %arg7[%c0_31, %c0_32], %65 {strides = array<i32>} : memref<8x128xf32, #tpu.memory_space<vmem>>, vector<8x128xf32>,
    return
  }
}

</mosaic_0001>

<bundles_post_ra>
// kernel: mlp_forward.1
= control target key start
LH: loop header
LB: loop body
LE: loop exit
PB: predicated region body
PF: predicated region fallthrough
CT: control target
= control target key end

     0   :  { %vm1206_vm0 = vmmov 0   ;;  %s1502_s1 = inlined_call_operand.vmem [shape: bf16[1024,128], index: 1, kind: input, shape index: {}]   ;;  %s1503_s0 = inlined_call_operand.vmem [shape: bf16[8,1024], index: 0, kind: input, shape index: {}]   ;;  %s1504_s4 = inlined_call_operand.vmem [shape: bf16[128,128], index: 4, kind: input, shape index: {}]   ;;  %s1505_s2 = inlined_call_operand.vmem [shape: f32[1,128], index: 2, kind: input, shape index: {}]   ;;  %s1506_s3 = inlined_call_operand.vmem [shape: f32[1,128], index: 3, kind: input, shape index: {}]   ;;  %s1507_s5 = inlined_call_operand.vmem [shape: f32[1,128], index: 5, kind: input, shape index: {}]   ;;  %s1508_s6 = inlined_call_operand.vmem [shape: f32[1,128], index: 6, kind: input, shape index: {}]   ;;  %s1509_s7 = inlined_call_operand.vmem [shape: f32[8,128], index: 7, kind: output, shape index: {}]  }
   0x1   :  { %v1121_v0 = vld [vmem:[%s1502_s1 + $0x40] sm:$0xff]   ;;  %v1125_v4 = vld [vmem:[%s1502_s1 + $0x48] sm:$0xff]   ;;  %v1129_v8 = vld [vmem:[%s1502_s1 + $0x50] sm:$0xff]  }
   0x2   :  { %v1122_v1 = vld [vmem:[%s1502_s1 + $0xc0] sm:$0xff]   ;;  %1002 = vmatprep.subr.bf16.mxu0 %v1121_v0  ;;  %v1126_v5 = vld [vmem:[%s1502_s1 + $0xc8] sm:$0xff]   ;;  %v1130_v9 = vld [vmem:[%s1502_s1 + $0xd0] sm:$0xff]  }
   0x3   :  { %v1123_v2 = vld [vmem:[%s1502_s1] sm:$0xff]   ;;  %1024 = vmatprep.subr.bf16.mxu1 %v1122_v1  ;;  %v1127_v6 = vld [vmem:[%s1502_s1 + $0x8] sm:$0xff]   ;;  %v1131_v10 = vld [vmem:[%s1502_s1 + $0x10] sm:$0xff]  }
   0x4   :  { %v1124_v3 = vld [vmem:[%s1502_s1 + $0x80] sm:$0xff]   ;;  %1003 = vmatpush3.bf16.msra.mxu0 %v1123_v2  ;;  %v1128_v7 = vld [vmem:[%s1502_s1 + $0x88] sm:$0xff]   ;;  %v1132_v11 = vld [vmem:[%s1502_s1 + $0x90] sm:$0xff]  }
   0x5   :  { %1025 = vmatpush3.bf16.msra.mxu1 %v1124_v3  ;;  %1004 = vmatprep.subr.bf16.mxu0 %v1125_v4  ;;  %v1133_v12 = vld [vmem:[%s1502_s1 + $0x58] sm:$0xff]   ;;  %v1137_v16 = vld [vmem:[%s1502_s1 + $0x60] sm:$0xff]   ;;  %v1141_v20 = vld [vmem:[%s1502_s1 + $0x68] sm:$0xff]  }
   0x6   :  { %1026 = vmatprep.subr.bf16.mxu1 %v1126_v5  ;;  %v1134_v13 = vld [vmem:[%s1502_s1 + $0xd8] sm:$0xff]   ;;  %v1138_v17 = vld [vmem:[%s1502_s1 + $0xe0] sm:$0xff]   ;;  %v1142_v21 = vld [vmem:[%s1502_s1 + $0xe8] sm:$0xff]  }
   0x7   :  { %v1135_v14 = vld [vmem:[%s1502_s1 + $0x18] sm:$0xff]   ;;  %v1139_v18 = vld [vmem:[%s1502_s1 + $0x20] sm:$0xff]   ;;  %v1143_v22 = vld [vmem:[%s1502_s1 + $0x28] sm:$0xff]  }
   0x8   :  { %1005 = vmatpush3.bf16.msra.mxu0 %v1127_v6  ;;  %v1136_v15 = vld [vmem:[%s1502_s1 + $0x98] sm:$0xff]   ;;  %v1140_v19 = vld [vmem:[%s1502_s1 + $0xa0] sm:$0xff]   ;;  %v1144_v23 = vld [vmem:[%s1502_s1 + $0xa8] sm:$0xff]  }
   0x9   :  { %1027 = vmatpush3.bf16.msra.mxu1 %v1128_v7  ;;  %1006 = vmatprep.subr.bf16.mxu0 %v1129_v8  ;;  %v1145_v24 = vld [vmem:[%s1502_s1 + $0x70] sm:$0xff]   ;;  %v1149_v28 = vld [vmem:[%s1502_s1 + $0x78] sm:$0xff]   ;;  %v27_v32 = vld [vmem:[%s1503_s0] sm:$0xff] }
   0xa   :  { %1028 = vmatprep.subr.bf16.mxu1 %v1130_v9  ;;  %v1146_v25 = vld [vmem:[%s1502_s1 + $0xf0] sm:$0xff]   ;;  %v1150_v29 = vld [vmem:[%s1502_s1 + $0xf8] sm:$0xff]   ;;  %v28_v33 = vld [vmem:[%s1503_s0 + $0x8] sm:$0xff]  ;;  %v920_v34 = vcombine.low %v27_v32, %v27_v32  ;;  %v921_v35 = vcombine.high %v27_v32, %v27_v32  ;;  %v731_v32 = vlaneseq }
   0xb   :  { %v1147_v26 = vld [vmem:[%s1502_s1 + $0x30] sm:$0xff]   ;;  %v1151_v30 = vld [vmem:[%s1502_s1 + $0x38] sm:$0xff]   ;;  %v922_v36 = vcombine.low %v28_v33, %v28_v33  ;;  %v923_v37 = vcombine.high %v28_v33, %v28_v33  ;;  %v1157_v38 = vld [vmem:[%s1502_s1 + $0x140] sm:$0xff]  }
   0xc   :  { %1007 = vmatpush3.bf16.msra.mxu0 %v1131_v10  ;;  %v1148_v27 = vld [vmem:[%s1502_s1 + $0xb0] sm:$0xff]   ;;  %v1152_v31 = vld [vmem:[%s1502_s1 + $0xb8] sm:$0xff]   ;;  %v1158_v39 = vld [vmem:[%s1502_s1 + $0x1c0] sm:$0xff]   ;;  %603 = vmatprep.mubr.bf16.mxu0 %v921_v35 }
   0xd   :  { %1029 = vmatpush3.bf16.msra.mxu1 %v1132_v11  ;;  %1008 = vmatprep.subr.bf16.mxu0 %v1133_v12  ;;  %v1159_v40 = vld [vmem:[%s1502_s1 + $0x100] sm:$0xff]   ;;  %v1161_v42 = vld [vmem:[%s1502_s1 + $0x148] sm:$0xff]   ;;  %v1165_v46 = vld [vmem:[%s1502_s1 + $0x150] sm:$0xff]  }
   0xe   :  { %1030 = vmatprep.subr.bf16.mxu1 %v1134_v13  ;;  %643 = vmatprep.mubr.bf16.mxu1 %v923_v37  ;;  %v1160_v41 = vld [vmem:[%s1502_s1 + $0x180] sm:$0xff]   ;;  %v1162_v43 = vld [vmem:[%s1502_s1 + $0x1c8] sm:$0xff]   ;;  %v1166_v47 = vld [vmem:[%s1502_s1 + $0x1d0] sm:$0xff]   ;;  %v1205_v13 = vmov 0.0   ;;  %v1475_v37 = vshrl.u32 %v731_v32, 7 }
   0xf   :  { %v1163_v44 = vld [vmem:[%s1502_s1 + $0x108] sm:$0xff]   ;;  %v1167_v48 = vld [vmem:[%s1502_s1 + $0x110] sm:$0xff]   ;;  %v1169_v50 = vld [vmem:[%s1502_s1 + $0x158] sm:$0xff]  }
  0x10   :  { %1009 = vmatpush3.bf16.msra.mxu0 %v1135_v14  ;;  %v1164_v45 = vld [vmem:[%s1502_s1 + $0x188] sm:$0xff]   ;;  %v1168_v49 = vld [vmem:[%s1502_s1 + $0x190] sm:$0xff]   ;;  %v1170_v51 = vld [vmem:[%s1502_s1 + $0x1d8] sm:$0xff]   ;;  %vm733_vm1 = vcmp.lt.s32.totalorder %v1475_v37, 2 }
  0x11   :  { %1031 = vmatpush3.bf16.msra.mxu1 %v1136_v15  ;;  %1010 = vmatprep.subr.bf16.mxu0 %v1137_v16  ;;  %v1171_v52 = vld [vmem:[%s1502_s1 + $0x118] sm:$0xff]   ;;  %v1173_v54 = vld [vmem:[%s1502_s1 + $0x160] sm:$0xff]   ;;  %v1177_v58 = vld [vmem:[%s1502_s1 + $0x168] sm:$0xff]  }
  0x12   :  { %1032 = vmatprep.subr.bf16.mxu1 %v1138_v17  ;;  %v1172_v53 = vld [vmem:[%s1502_s1 + $0x198] sm:$0xff]   ;;  %v1174_v55 = vld [vmem:[%s1502_s1 + $0x1e0] sm:$0xff]   ;;  %v1178_v59 = vld [vmem:[%s1502_s1 + $0x1e8] sm:$0xff]  }
  0x13   :  { %v1175_v56 = vld [vmem:[%s1502_s1 + $0x120] sm:$0xff]   ;;  %v1179_v60 = vld [vmem:[%s1502_s1 + $0x128] sm:$0xff]   ;;  %v1181_v62 = vld [vmem:[%s1502_s1 + $0x170] sm:$0xff]  }
  0x14   :  { %1011 = vmatpush3.bf16.msra.mxu0 %v1139_v18  ;;  %v1176_v57 = vld [vmem:[%s1502_s1 + $0x1a0] sm:$0xff]   ;;  %v1180_v61 = vld [vmem:[%s1502_s1 + $0x1a8] sm:$0xff]   ;;  %v1182_v63 = vld [vmem:[%s1502_s1 + $0x1f0] sm:$0xff]  }
  0x15   :  { %1033 = vmatpush3.bf16.msra.mxu1 %v1140_v19  ;;  %1012 = vmatprep.subr.bf16.mxu0 %v1141_v20  ;;  %v1183_v0 = vld [vmem:[%s1502_s1 + $0x130] sm:$0xff]   ;;  %v1185_v2 = vld [vmem:[%s1502_s1 + $0x178] sm:$0xff]   ;;  %v1193_v12 = vld [vmem:[%s1504_s4] sm:$0xff]  }
  0x16   :  { %1034 = vmatprep.subr.bf16.mxu1 %v1142_v21  ;;  %v1184_v1 = vld [vmem:[%s1502_s1 + $0x1b0] sm:$0xff]   ;;  %v1186_v3 = vld [vmem:[%s1502_s1 + $0x1f8] sm:$0xff]   ;;  %v1194_v14 = vld [vmem:[%s1504_s4 + $0x8] sm:$0xff]  }
  0x17   :  { %v1187_v4 = vld [vmem:[%s1502_s1 + $0x138] sm:$0xff]   ;;  %v29_v6 = vld [vmem:[%s1503_s0 + $0x10] sm:$0xff]  ;;  %v1197_v17 = vld [vmem:[%s1504_s4 + $0x20] sm:$0xff]  }
  0x18   :  { %1013 = vmatpush3.bf16.msra.mxu0 %v1143_v22  ;;  %v1188_v5 = vld [vmem:[%s1502_s1 + $0x1b8] sm:$0xff]   ;;  %v924_v7 = vcombine.low %v29_v6, %v29_v6  ;;  %v925_v8 = vcombine.high %v29_v6, %v29_v6  ;;  %v1195_v15 = vld [vmem:[%s1504_s4 + $0x10] sm:$0xff]   ;;  %v1198_v18 = vld [vmem:[%s1504_s4 + $0x28] sm:$0xff]  }
  0x19   :  { %1035 = vmatpush3.bf16.msra.mxu1 %v1144_v23  ;;  %1014 = vmatprep.subr.bf16.mxu0 %v1145_v24  ;;  %v30_v9 = vld [vmem:[%s1503_s0 + $0x18] sm:$0xff]  ;;  %v1199_v19 = vld [vmem:[%s1504_s4 + $0x30] sm:$0xff]   ;;  %v992_v6 = vld [vmem:[%s1506_s3] ss:$0 sm:$0xff] }
  0x1a   :  { %1036 = vmatprep.subr.bf16.mxu1 %v1146_v25  ;;  %v926_v10 = vcombine.low %v30_v9, %v30_v9  ;;  %v927_v11 = vcombine.high %v30_v9, %v30_v9  ;;  %v1196_v16 = vld [vmem:[%s1504_s4 + $0x18] sm:$0xff]  }
  0x1b   :  { %v1200_v20 = vld [vmem:[%s1504_s4 + $0x38] sm:$0xff]  }
  0x1c   :  { %1015 = vmatpush3.bf16.msra.mxu0 %v1147_v26 }
  0x1d   :  { %1037 = vmatpush3.bf16.msra.mxu1 %v1148_v27  ;;  %1016 = vmatprep.subr.bf16.mxu0 %v1149_v28 }
  0x1e   :  { %1038 = vmatprep.subr.bf16.mxu1 %v1150_v29 }
  0x20   :  { %1017 = vmatpush3.bf16.msra.mxu0 %v1151_v30 }
  0x21   :  { %1039 = vmatpush3.bf16.msra.mxu1 %v1152_v31  ;;  %1046 = vmatprep.subr.bf16.mxu0 %v1157_v38 }
  0x22   :  { %1068 = vmatprep.subr.bf16.mxu1 %v1158_v39 }
  0x23   :  { %604 = vmatmul.mubr.bf16.vlgmr.msra.gmra.mrb[0].mxu0 %v920_v34 }
  0x24   :  { %644 = vmatmul.mubr.bf16.vlgmr.msra.gmra.mrb[0].mxu1 %v922_v36  ;;  %1047 = vmatpush3.bf16.msra.mxu0 %v1159_v40 }
  0x25   :  { %1069 = vmatpush3.bf16.msra.mxu1 %v1160_v41  ;;  %1048 = vmatprep.subr.bf16.mxu0 %v1161_v42 }
  0x26   :  { %1070 = vmatprep.subr.bf16.mxu1 %v1162_v43  ;;  %683 = vmatprep.mubr.bf16.mxu0 %v925_v8 }
  0x27   :  { %723 = vmatprep.mubr.bf16.mxu1 %v927_v11 }
  0x28   :  { %1049 = vmatpush3.bf16.msra.mxu0 %v1163_v44 }
  0x29   :  { %1071 = vmatpush3.bf16.msra.mxu1 %v1164_v45  ;;  %1050 = vmatprep.subr.bf16.mxu0 %v1165_v46 }
  0x2a   :  { %1072 = vmatprep.subr.bf16.mxu1 %v1166_v47 }
  0x2c   :  { %1051 = vmatpush3.bf16.msra.mxu0 %v1167_v48 }
  0x2d   :  { %1073 = vmatpush3.bf16.msra.mxu1 %v1168_v49  ;;  %1052 = vmatprep.subr.bf16.mxu0 %v1169_v50 }
  0x2e   :  { %1074 = vmatprep.subr.bf16.mxu1 %v1170_v51 }
  0x30   :  { %1053 = vmatpush3.bf16.msra.mxu0 %v1171_v52 }
  0x31   :  { %1075 = vmatpush3.bf16.msra.mxu1 %v1172_v53  ;;  %1054 = vmatprep.subr.bf16.mxu0 %v1173_v54 }
  0x32   :  { %1076 = vmatprep.subr.bf16.mxu1 %v1174_v55 }
  0x34   :  { %1055 = vmatpush3.bf16.msra.mxu0 %v1175_v56 }
  0x35   :  { %1077 = vmatpush3.bf16.msra.mxu1 %v1176_v57  ;;  %1056 = vmatprep.subr.bf16.mxu0 %v1177_v58 }
  0x36   :  { %1078 = vmatprep.subr.bf16.mxu1 %v1178_v59 }
  0x38   :  { %1057 = vmatpush3.bf16.msra.mxu0 %v1179_v60 }
  0x39   :  { %1079 = vmatpush3.bf16.msra.mxu1 %v1180_v61  ;;  %1058 = vmatprep.subr.bf16.mxu0 %v1181_v62 }
  0x3a   :  { %1080 = vmatprep.subr.bf16.mxu1 %v1182_v63 }
  0x3c   :  { %1059 = vmatpush3.bf16.msra.mxu0 %v1183_v0 }
  0x3d   :  { %1081 = vmatpush3.bf16.msra.mxu1 %v1184_v1  ;;  %1060 = vmatprep.subr.bf16.mxu0 %v1185_v2  ;;  %v752_v1 = vld [vmem:[%s1505_s2] sm:$0x1]  ;;  %v759_v2 = vsub.s32 0, %v1475_v37 }
  0x3e   :  { %1082 = vmatprep.subr.bf16.mxu1 %v1186_v3  ;;  %v1001_v37 = vld [vmem:[%s1508_s6] ss:$0 sm:$0xff] }
  0x40   :  { %1061 = vmatpush3.bf16.msra.mxu0 %v1187_v4 }
  0x41   :  { %1083 = vmatpush3.bf16.msra.mxu1 %v1188_v5  ;;  %1099 = vmatprep.subr.bf16.mxu0 %v1205_v13 }
  0x43   :  { %684 = vmatmul.mubr.bf16.vlgmr.msra.gmra.mrb[4].mxu0 %v924_v7 }
  0x44   :  { %724 = vmatmul.mubr.bf16.vlgmr.msra.gmra.mrb[4].mxu1 %v926_v10  ;;  %1100 = vmatpush3.bf16.msra.mxu0 %v1193_v12 }
  0x45   :  { %1101 = vmatprep.subr.bf16.mxu0 %v1205_v13  ;;  %1115 = vmatprep.mubr.msk.bf16.mxu0 %vm1206_vm0, %v1205_v13 }
  0x48   :  { %1102 = vmatpush3.bf16.msra.mxu0 %v1194_v14 }
  0x49   :  { %1103 = vmatprep.subr.bf16.mxu0 %v1205_v13 }
  0x4c   :  { %1104 = vmatpush3.bf16.msra.mxu0 %v1195_v15 }
  0x4d   :  { %1105 = vmatprep.subr.bf16.mxu0 %v1205_v13 }
  0x50   :  { %1106 = vmatpush3.bf16.msra.mxu0 %v1196_v16 }
  0x51   :  { %1107 = vmatprep.subr.bf16.mxu0 %v1205_v13 }
  0x54   :  { %1108 = vmatpush3.bf16.msra.mxu0 %v1197_v17 }
  0x55   :  { %1109 = vmatprep.subr.bf16.mxu0 %v1205_v13 }
  0x58   :  { %1110 = vmatpush3.bf16.msra.mxu0 %v1198_v18 }
  0x59   :  { %1111 = vmatprep.subr.bf16.mxu0 %v1205_v13 }
  0x5c   :  { %1112 = vmatpush3.bf16.msra.mxu0 %v1199_v19 }
  0x5d   :  { %1113 = vmatprep.subr.bf16.mxu0 %v1205_v13 }
  0x60   :  { %1114 = vmatpush3.bf16.msra.mxu0 %v1200_v20 }
  0xf6   :  { %v1018_v21 = vpop.f32.mrb[0].mxu0 }
  0xf7   :  { %v1040_v22 = vpop.f32.mrb[0].mxu1  ;;  %v1019_v23 = vpop.f32.mrb[1].mxu0 }
  0xf8   :  { %v1041_v24 = vpop.f32.mrb[1].mxu1  ;;  %v1020_v25 = vadd.f32 %v1019_v23, %v1018_v21  ;;  %v1021_v27 = vpop.f32.mrb[2].mxu0 }
  0xf9   :  { %v1042_v26 = vadd.f32 %v1041_v24, %v1040_v22  ;;  %v1043_v28 = vpop.f32.mrb[2].mxu1  ;;  %v1022_v29 = vpop.f32.mrb[3].mxu0 }
  0xfa   :  { %v1044_v30 = vpop.f32.mrb[3].mxu1 }
  0xfb   :  { %v646_v31 = vadd.f32 %v1042_v26, %v1020_v25 }
 0x116   :  { %v1062_v33 = vpop.f32.mrb[4].mxu0 }
 0x117   :  { %v1084_v34 = vpop.f32.mrb[4].mxu1  ;;  %v1063_v35 = vpop.f32.mrb[5].mxu0 }
 0x118   :  { %v1085_v36 = vpop.f32.mrb[5].mxu1  ;;  %v1064_v38 = vadd.f32 %v1063_v35, %v1062_v33  ;;  %v1065_v40 = vpop.f32.mrb[6].mxu0 }
 0x119   :  { %v1086_v39 = vadd.f32 %v1085_v36, %v1084_v34  ;;  %v1087_v41 = vpop.f32.mrb[6].mxu1  ;;  %v1066_v42 = vpop.f32.mrb[7].mxu0  ;;  %v895_v34 = vld [vmem:[%s1507_s5] sm:$0x1] }
 0x11a   :  { %v1088_v43 = vpop.f32.mrb[7].mxu1  ;;  %v686_v44 = vadd.f32 %v1064_v38, %v646_v31 }
 0x11c   :  { %v726_v45 = vadd.f32 %v1086_v39, %v686_v44 }
 0x11e   :  { %v734_v46 = vsel %vm733_vm1, %v726_v45, 0.0 }
 0x11f   :  { %v735_v47 = vrot.slane %v734_v46, 4 }
 0x121   :  { %v736_v48 = vadd.f32 %v735_v47, %v734_v46 }
 0x123   :  { %v737_v49 = vrot.slane %v736_v48, 2 }
 0x125   :  { %v738_v50 = vadd.f32 %v737_v49, %v736_v48 }
 0x127   :  { %v739_v51 = vrot.slane %v738_v50, 1 }
 0x129   :  { %v740_v52 = vadd.f32 %v739_v51, %v738_v50 }
 0x12b   :  { %v741_v53 = vmul.f32 0.5, %v740_v52 }
 0x12d   :  { %v742_v54 = vsub.f32 %v726_v45, %v741_v53 }
 0x12f   :  { %v743_v55 = vmul.f32 %v742_v54, %v742_v54 }
 0x131   :  { %v744_v56 = vsel %vm733_vm1, %v743_v55, 0.0 }
 0x132   :  { %v745_v57 = vrot.slane %v744_v56, 4 }
 0x134   :  { %v746_v58 = vadd.f32 %v745_v57, %v744_v56 }
 0x136   :  { %v747_v59 = vrot.slane %v746_v58, 2 }
 0x138   :  { %v748_v60 = vadd.f32 %v747_v59, %v746_v58 }
 0x13a   :  { %v749_v61 = vrot.slane %v748_v60, 1 }
 0x13c   :  { %v750_v62 = vadd.f32 %v749_v61, %v748_v60 }
 0x13e   :  { %v751_v63 = vmul.f32 0.5, %v750_v62 }
 0x140   :  { %v753_v0 = vadd.f32 1e-05, %v751_v63 }
 0x142   :  { %1201 = vrsqrt.f32 %v753_v0 }
 0x14c   :  { %v1202_v3 = vpop.eup %1201 }
 0x14d   :  { %v755_v4 = vmul.f32 %v1202_v3, %v752_v1 }
 0x14f   :  { %v760_v5 = vrot.slane %v755_v4, %v759_v2 }
 0x151   :  { %v762_v7 = vmul.f32 %v760_v5, %v742_v54 }
 0x153   :  { %v770_v8 = vadd.f32 %v992_v6, %v762_v7 }
 0x155   :  { %v771_v9 = vmax.f32 %v770_v8, 0.0 }
 0x157   :  { %v772_v10 = vpack.c.bf16 %v771_v9, %v771_v9 }
 0x159   :  { %1116 = vmatmul.mubr.bf16.vlgmr.msra.gmra.mrb[8].mxu0 %v772_v10 }
 0x22c   :  { %v871_v11 = vpop.f32.mrb[8].mxu0 }
 0x22d   :  { %v877_v12 = vsel %vm733_vm1, %v871_v11, 0.0  ;;  %v1117_v13 = vpop.f32.mrb[9].mxu0 }
 0x22e   :  { %v878_v14 = vrot.slane %v877_v12, 4  ;;  %v874_v15 = vpop.f32.mrb[10].mxu0 }
 0x22f   :  { %v1118_v16 = vpop.f32.mrb[11].mxu0 }
 0x230   :  { %v879_v17 = vadd.f32 %v878_v14, %v877_v12 }
 0x232   :  { %v880_v18 = vrot.slane %v879_v17, 2 }
 0x234   :  { %v881_v19 = vadd.f32 %v880_v18, %v879_v17 }
 0x236   :  { %v882_v20 = vrot.slane %v881_v19, 1 }
 0x238   :  { %v883_v21 = vadd.f32 %v882_v20, %v881_v19 }
 0x23a   :  { %v884_v22 = vmul.f32 0.5, %v883_v21 }
 0x23c   :  { %v885_v23 = vsub.f32 %v871_v11, %v884_v22 }
 0x23e   :  { %v886_v24 = vmul.f32 %v885_v23, %v885_v23 }
 0x240   :  { %v887_v25 = vsel %vm733_vm1, %v886_v24, 0.0 }
 0x241   :  { %v888_v26 = vrot.slane %v887_v25, 4 }
 0x243   :  { %v889_v27 = vadd.f32 %v888_v26, %v887_v25 }
 0x245   :  { %v890_v28 = vrot.slane %v889_v27, 2 }
 0x247   :  { %v891_v29 = vadd.f32 %v890_v28, %v889_v27 }
 0x249   :  { %v892_v30 = vrot.slane %v891_v29, 1 }
 0x24b   :  { %v893_v31 = vadd.f32 %v892_v30, %v891_v29 }
 0x24d   :  { %v894_v32 = vmul.f32 0.5, %v893_v31 }
 0x24f   :  { %v896_v33 = vadd.f32 1e-05, %v894_v32 }
 0x251   :  { %1203 = vrsqrt.f32 %v896_v33 }
 0x25b   :  { %v1204_v35 = vpop.eup %1203 }
 0x25c   :  { %v898_v36 = vmul.f32 %v1204_v35, %v895_v34 }
 0x25e   :  { %v903_v38 = vrot.slane %v898_v36, %v759_v2 }
 0x260   :  { %v905_v39 = vmul.f32 %v903_v38, %v885_v23 }
 0x262   :  { %v913_v40 = vadd.f32 %v1001_v37, %v905_v39 }
 0x264   :  { %v914_v41 = vmax.f32 %v913_v40, 0.0 }
 0x266   :  { %915 = vst [vmem:[%s1509_s7] sm:$0xff] %v914_v41 }

</bundles_post_ra>
